<compile_context>
chip_gen: v7x
topology: tpu7x:2x2x1
jax: 0.10.0
libtpu: 0.0.40
codegen_flags: <defaults>
</compile_context>

<pallas_src>
import jax
import jax.numpy as jnp
from jax import lax
from jax.experimental import pallas as pl
from jax.experimental.pallas import tpu as pltpu

_SQRT5 = 5.0 ** 0.5
_EPS = 1e-12          # matches _torch_sqrt
_LANE = 128
_SUBLANE = 8
_MXU_MIN_D = 8        # expansion/MXU path for moderate-to-large contraction dims
_LANE_TILE_CAP = 512          # output lane-tile cap (multiple of 128)
_SUB_TILE_CAP_MXU = 256       # output sublane-tile cap on the MXU path
_SUB_TILE_CAP_VPU = 512       # output sublane-tile cap on the VPU path


def _vmem_budgets():
    """Per-generation VMEM working-set budget and compiler limit (bytes)."""
    cap = 64 << 20
    try:
        info = pltpu.get_tpu_info()
        cap = int(getattr(info, "vmem_capacity_bytes", None) or (64 << 20))
    except Exception:
        pass
    # double-buffered working-set target: ~25 MiB on v7x (64 MiB VMEM),
    # ~48 MiB on v5e/v6e (128 MiB VMEM).
    budget = min(int(cap * 0.40), 48 << 20)
    limit = min(int(cap * 0.75), 100 << 20)
    return budget, limit


def _make_matern52_kernel(use_mxu):
    def kernel(x_ref, zt_ref, ilsx_ref, ilsz_ref, o_ref):
        # x_ref  : (BK, BN, tT,  D)   rows,    D on lanes
        # zt_ref : (BK, BN, D,  tTz)  columns, Tz on lanes (pre-transposed)
        # ilsx   : (1,  BN, 1,  D)    1 / lengthscale (row layout)
        # ilsz   : (1,  BN, D,  1)    1 / lengthscale (column layout)
        # o_ref  : (BK, BN, tT, tTz)
        f32 = jnp.float32
        bk, bn, tt, d = x_ref.shape
        ttz = zt_ref.shape[-1]
        b = bk * bn
        x = (x_ref[...].astype(f32) * ilsx_ref[...].astype(f32)).reshape(b, tt, d)
        zt = (zt_ref[...].astype(f32) * ilsz_ref[...].astype(f32)).reshape(b, d, ttz)

        if use_mxu:
            # ||x||^2 - 2 x.z + ||z||^2 expansion; cross term on the MXU.
            # Kept in f32 (no bf16 cast) to avoid diagonal cancellation error.
            x2 = jnp.sum(x * x, axis=-1, keepdims=True)            # (b, tT, 1)
            z2 = jnp.sum(zt * zt, axis=-2, keepdims=True)          # (b, 1, tTz)
            xz = jnp.matmul(x, zt, preferred_element_type=f32)     # (b, tT, tTz)
            r2 = jnp.maximum(x2 - 2.0 * xz + z2, 0.0)              # clamp(min=0)
        else:
            # Tiny D: direct squared differences on the VPU, unrolled over D.
            d0 = x[:, :, 0:1] - zt[:, 0:1, :]
            r2 = d0 * d0
            for i in range(1, d):
                dd = x[:, :, i:i + 1] - zt[:, i:i + 1, :]
                r2 = r2 + dd * dd

        r = jnp.sqrt(r2 + _EPS)                                    # _torch_sqrt
        s = _SQRT5 * r
        out = (1.0 + s + (5.0 / 3.0) * r2) * jnp.exp(-s)
        o_ref[...] = out.reshape(bk, bn, tt, ttz).astype(o_ref.dtype)

    return kernel


def matern52_forward(X, Z=None, lengthscale_nd=None, diag=False,
                     track_dims=None, out_dtype=None):
    """Pallas TPU implementation of Matern52.forward (euclid topology).

    X              : (K, N, T, D)
    Z              : (K, N, Tz, D) or None (-> Z = X)
    lengthscale_nd : (N, D) positive per-neuron lengthscales (post link fn)
    track_dims     : optional list of input dims to use (Kernel._slice_input)
    out_dtype      : output dtype (default X.dtype); math is f32 internally
    """
    X = jnp.asarray(X)
    lengthscale_nd = jnp.asarray(lengthscale_nd)
    out_dtype = X.dtype if out_dtype is None else out_dtype
    if diag:
        return jnp.ones((X.shape[0], lengthscale_nd.shape[0], X.shape[2]),
                        out_dtype)

    Zin = X if Z is None else jnp.asarray(Z)
    if track_dims is not None:
        X = X[..., tuple(track_dims)]
        Zin = Zin[..., tuple(track_dims)]

    K, N, T, D = X.shape
    Tz = Zin.shape[2]
    assert Zin.shape[-1] == D, "Inputs must have the same number of features."
    assert lengthscale_nd.shape == (N, D)

    # Transposed-output trick: if the natural lane dim (Tz) is narrow while T is
    # wide, swap roles (k(x,z) = k(z,x)) so stores stay lane-dense; transpose once
    # at the end.  Avoids padding a tiny Tz up to 128 lanes (16x waste for Tz=8).
    swapped = (Tz < _LANE) and (T >= _LANE) and (T > Tz)
    if swapped:
        X, Zin = Zin, X
        T, Tz = Tz, T

    use_mxu = D >= _MXU_MIN_D
    lane_cap = _LANE_TILE_CAP
    sub_cap = _SUB_TILE_CAP_MXU if use_mxu else _SUB_TILE_CAP_VPU

    # Tiles are either the full dim (always legal) or a multiple of 8/128 (caps),
    # so the (8, 128) block constraint is always satisfied and boundary blocks,
    # when they occur, are clamped by the pipeline (no pad / no output slice).
    tTz = min(Tz, lane_cap)
    tT = min(T, sub_cap)

    vmem_budget, vmem_limit = _vmem_budgets()

    def blk_bytes(bk, bn, tt, ttz):
        out_b = bk * bn * tt * ttz
        x_b = bk * bn * tt * D
        z_b = bk * bn * D * ttz
        l_b = bn * D * 2
        return 2 * 4 * (out_b + x_b + z_b + l_b)   # double-buffered, f32

    # Shrink tiles only if even a single-neuron block blows the budget (huge D);
    # keep hardware alignment when shrinking.
    while blk_bytes(1, 1, tT, tTz) > vmem_budget and tTz > _LANE:
        tTz = max(_LANE, (tTz // 2) // _LANE * _LANE)
    while blk_bytes(1, 1, tT, tTz) > vmem_budget and tT > _SUBLANE:
        tT = max(_SUBLANE, (tT // 2) // _SUBLANE * _SUBLANE)

    # Neurons per step from the full (inputs + output) budget; fold samples in
    # (BK > 1) only once every neuron already fits.
    BN = max(1, min(N, vmem_budget // max(1, blk_bytes(1, 1, tT, tTz))))
    BK = 1
    if BN == N and K > 1:
        BK = max(1, min(K, vmem_budget // max(1, blk_bytes(1, N, tT, tTz))))

    n_nb = pl.cdiv(N, BN)
    n_kb = pl.cdiv(K, BK)
    n_ti = pl.cdiv(T, tT)
    n_tj = pl.cdiv(Tz, tTz)

    # Loop order: re-stream the smaller operand across the innermost tile axis.
    traffic_tj_inner = T * D + n_ti * D * Tz   # X tile resident across tj
    traffic_ti_inner = D * Tz + n_tj * T * D   # Zt tile resident across ti
    tj_inner = traffic_tj_inner <= traffic_ti_inner

    Zt = jnp.swapaxes(Zin, -1, -2)                        # (K, N, D, Tz)
    inv_ls = 1.0 / lengthscale_nd.astype(jnp.float32)     # reciprocal in wrapper
    ils_x = inv_ls[None, :, None, :]                      # (1, N, 1, D)
    ils_z = inv_ls[None, :, :, None]                      # (1, N, D, 1)

    if tj_inner:
        grid = (n_nb, n_kb, n_ti, n_tj)
        x_map = lambda nb, kb, ti, tj: (kb, nb, ti, 0)
        z_map = lambda nb, kb, ti, tj: (kb, nb, 0, tj)
        o_map = lambda nb, kb, ti, tj: (kb, nb, ti, tj)
        l_map = lambda nb, kb, ti, tj: (0, nb, 0, 0)
    else:
        grid = (n_nb, n_kb, n_tj, n_ti)
        x_map = lambda nb, kb, tj, ti: (kb, nb, ti, 0)
        z_map = lambda nb, kb, tj, ti: (kb, nb, 0, tj)
        o_map = lambda nb, kb, tj, ti: (kb, nb, ti, tj)
        l_map = lambda nb, kb, tj, ti: (0, nb, 0, 0)

    kernel = _make_matern52_kernel(use_mxu)

    out = pl.pallas_call(
        kernel,
        out_shape=jax.ShapeDtypeStruct((K, N, T, Tz), out_dtype),
        grid=grid,
        in_specs=[
            pl.BlockSpec((BK, BN, tT, D), x_map),
            pl.BlockSpec((BK, BN, D, tTz), z_map),
            pl.BlockSpec((1, BN, 1, D), l_map),
            pl.BlockSpec((1, BN, D, 1), l_map),
        ],
        out_specs=pl.BlockSpec((BK, BN, tT, tTz), o_map),
        compiler_params=pltpu.CompilerParams(
            dimension_semantics=("parallel", "parallel", "arbitrary", "arbitrary"),
            vmem_limit_bytes=int(vmem_limit)),
    )(X, Zt, ils_x, ils_z)

    if swapped:
        out = jnp.swapaxes(out, -1, -2)
    return out


def _matern52_ref(X, Z, lengthscale_nd):
    """Pure-JAX reference replicating the torch module (expansion form, f32)."""
    ls = lengthscale_nd[None, :, None, :]
    sx = X / ls
    sz = Z / ls
    X2 = jnp.sum(sx ** 2, axis=-1, keepdims=True)
    Z2 = jnp.sum(sz ** 2, axis=-1, keepdims=True)
    XZ = jnp.einsum("kntd,knsd->knts", sx, sz, precision=lax.Precision.HIGHEST)
    r2 = jnp.clip(X2 - 2.0 * XZ + jnp.swapaxes(Z2, -1, -2), 0.0, None)
    r = jnp.sqrt(r2 + _EPS)
    s = _SQRT5 * r
    return (1.0 + s + (5.0 / 3.0) * r2) * jnp.exp(-s)


if __name__ == "__main__":
    key = jax.random.PRNGKey(0)
    K, N, T, D = 2, 4, 16, 3          # samples, neurons, timesteps, input_dims
    kx, kz, kl, kx2, kl2, kx3, kz3, kl3 = jax.random.split(key, 8)

    X = jax.random.normal(kx, (K, N, T, D), dtype=jnp.float32)

    # Parameter init following the module: lengthscale given as (dims, neurons),
    # stored as log(lengthscale).T; effective lengthscale = exp(param), shape (N, D).
    ls_dn = 0.5 + jax.random.uniform(kl, (D, N), dtype=jnp.float32)   # (D, N)
    lengthscale_nd = jnp.exp(jnp.log(ls_dn).T)                        # (N, D)

    # 1) symmetric covariance (Z = None) -- small-D VPU path
    out = jax.block_until_ready(matern52_forward(X, None, lengthscale_nd))
    ref = _matern52_ref(X, X, lengthscale_nd)
    assert out.shape == (K, N, T, T)
    assert jnp.allclose(out, ref, atol=3e-5, rtol=1e-5), "mismatch (symmetric)"

    # 2) cross covariance with Tz != T
    Tz = 8
    Zc = jax.random.normal(kz, (K, N, Tz, D), dtype=jnp.float32)
    out2 = jax.block_until_ready(matern52_forward(X, Zc, lengthscale_nd))
    ref2 = _matern52_ref(X, Zc, lengthscale_nd)
    assert out2.shape == (K, N, T, Tz)
    assert jnp.allclose(out2, ref2, atol=3e-5, rtol=1e-5), "mismatch (cross)"

    # 3) large-D MXU expansion path.  The in-kernel f32 contraction may use
    #    reduced-precision MXU passes vs. the HIGHEST-precision reference, so
    #    this is a deliberately loose structural check.
    D2 = 64
    X3 = 0.1 * jax.random.normal(kx2, (K, N, T, D2), dtype=jnp.float32)
    ls3 = jnp.exp(0.1 * jax.random.normal(kl2, (N, D2), dtype=jnp.float32))
    out3 = jax.block_until_ready(matern52_forward(X3, None, ls3))
    ref3 = _matern52_ref(X3, X3, ls3)
    assert out3.shape == (K, N, T, T)
    assert jnp.allclose(out3, ref3, atol=2e-2, rtol=2e-2), "mismatch (large D)"

    # 4) diag fast path (matches the torch module's ones output)
    dg = matern52_forward(X, None, lengthscale_nd, diag=True)
    assert dg.shape == (K, N, T) and bool(jnp.all(dg == 1.0))

    # 5) wide-T / narrow-Tz cross covariance (exercises the transposed-output path)
    K5, N5, T5, Tz5 = 1, 2, 128, 8
    X5 = jax.random.normal(kx3, (K5, N5, T5, D), dtype=jnp.float32)
    Z5 = jax.random.normal(kz3, (K5, N5, Tz5, D), dtype=jnp.float32)
    ls5 = jnp.exp(0.2 * jax.random.normal(kl3, (N5, D), dtype=jnp.float32))
    out5 = jax.block_until_ready(matern52_forward(X5, Z5, ls5))
    ref5 = _matern52_ref(X5, Z5, ls5)
    assert out5.shape == (K5, N5, T5, Tz5)
    assert jnp.allclose(out5, ref5, atol=3e-5, rtol=1e-5), "mismatch (transposed path)"

    print("KERNEL_OK")
</pallas_src>

<mosaic_0001>
module attributes {stable_mosaic.version = 11 : i64} {
  func.func @kernel(%arg0: i32, %arg1: i32, %arg2: i32, %arg3: i32, %arg4: memref<2x4x16x3xf32, #tpu.memory_space<vmem>>, %arg5: memref<2x4x3x16xf32, #tpu.memory_space<vmem>>, %arg6: memref<1x4x1x3xf32, #tpu.memory_space<vmem>>, %arg7: memref<1x4x3x1xf32, #tpu.memory_space<vmem>>, %arg8: memref<2x4x16x16xf32, #tpu.memory_space<vmem>>) attributes {dimension_semantics = [#tpu.dimension_semantics<parallel>, #tpu.dimension_semantics<parallel>, #tpu.dimension_semantics<arbitrary>, #tpu.dimension_semantics<arbitrary>], iteration_bounds = array<i64: 1, 1, 1, 1>, scalar_prefetch = 0 : i64, scratch_operands = 0 : i64, tpu.core_type = #tpu.core_type<tc>, window_params = [{transform_indices = @transform_0, window_bounds = array<i64: 2, 4, 16, 3>}, {transform_indices = @transform_1, window_bounds = array<i64: 2, 4, 3, 16>}, {transform_indices = @transform_2, window_bounds = array<i64: 1, 4, 1, 3>}, {transform_indices = @transform_3, window_bounds = array<i64: 1, 4, 3, 1>}, {transform_indices = @transform_4, window_bounds = array<i64: 2, 4, 16, 16>}]} {
    %c0 = arith.constant 0 : index
    %c0_0 = arith.constant 0 : index
    %c0_1 = arith.constant 0 : index
    %c0_2 = arith.constant 0 : index
    %0 = vector.load %arg4[%c0, %c0_0, %c0_1, %c0_2] : memref<2x4x16x3xf32, #tpu.memory_space<vmem>>, vector<2x4x16x3xf32>
    %c0_3 = arith.constant 0 : index
    %c0_4 = arith.constant 0 : index
    %c0_5 = arith.constant 0 : index
    %c0_6 = arith.constant 0 : index
    %1 = vector.load %arg6[%c0_3, %c0_4, %c0_5, %c0_6] : memref<1x4x1x3xf32, #tpu.memory_space<vmem>>, vector<1x4x1x3xf32>
    %2 = vector.broadcast %1 : vector<1x4x1x3xf32> to vector<2x4x16x3xf32>
    %3 = arith.mulf %0, %2 : vector<2x4x16x3xf32>
    %4 = vector.shape_cast %3 : vector<2x4x16x3xf32> to vector<8x16x3xf32>
    %c0_7 = arith.constant 0 : index
    %c0_8 = arith.constant 0 : index
    %c0_9 = arith.constant 0 : index
    %c0_10 = arith.constant 0 : index
    %5 = vector.load %arg5[%c0_7, %c0_8, %c0_9, %c0_10] : memref<2x4x3x16xf32, #tpu.memory_space<vmem>>, vector<2x4x3x16xf32>
    %c0_11 = arith.constant 0 : index
    %c0_12 = arith.constant 0 : index
    %c0_13 = arith.constant 0 : index
    %c0_14 = arith.constant 0 : index
    %6 = vector.load %arg7[%c0_11, %c0_12, %c0_13, %c0_14] : memref<1x4x3x1xf32, #tpu.memory_space<vmem>>, vector<1x4x3x1xf32>
    %7 = vector.broadcast %6 : vector<1x4x3x1xf32> to vector<2x4x3x16xf32>
    %8 = arith.mulf %5, %7 : vector<2x4x3x16xf32>
    %9 = vector.shape_cast %8 : vector<2x4x3x16xf32> to vector<8x3x16xf32>
    %10 = vector.extract_strided_slice %4 {offsets = [0, 0, 0], sizes = [8, 16, 1], strides = [1, 1, 1]} : vector<8x16x3xf32> to vector<8x16x1xf32>
    %11 = vector.extract_strided_slice %9 {offsets = [0, 0, 0], sizes = [8, 1, 16], strides = [1, 1, 1]} : vector<8x3x16xf32> to vector<8x1x16xf32>
    %12 = vector.broadcast %10 : vector<8x16x1xf32> to vector<8x16x16xf32>
    %13 = vector.broadcast %11 : vector<8x1x16xf32> to vector<8x16x16xf32>
    %14 = arith.subf %12, %13 : vector<8x16x16xf32>
    %15 = arith.mulf %14, %14 : vector<8x16x16xf32>
    %16 = vector.extract_strided_slice %4 {offsets = [0, 0, 1], sizes = [8, 16, 1], strides = [1, 1, 1]} : vector<8x16x3xf32> to vector<8x16x1xf32>
    %17 = vector.extract_strided_slice %9 {offsets = [0, 1, 0], sizes = [8, 1, 16], strides = [1, 1, 1]} : vector<8x3x16xf32> to vector<8x1x16xf32>
    %18 = vector.broadcast %16 : vector<8x16x1xf32> to vector<8x16x16xf32>
    %19 = vector.broadcast %17 : vector<8x1x16xf32> to vector<8x16x16xf32>
    %20 = arith.subf %18, %19 : vector<8x16x16xf32>
    %21 = arith.mulf %20, %20 : vector<8x16x16xf32>
    %22 = arith.addf %15, %21 : vector<8x16x16xf32>
    %23 = vector.extract_strided_slice %4 {offsets = [0, 0, 2], sizes = [8, 16, 1], strides = [1, 1, 1]} : vector<8x16x3xf32> to vector<8x16x1xf32>
    %24 = vector.extract_strided_slice %9 {offsets = [0, 2, 0], sizes = [8, 1, 16], strides = [1, 1, 1]} : vector<8x3x16xf32> to vector<8x1x16xf32>
    %25 = vector.broadcast %23 : vector<8x16x1xf32> to vector<8x16x16xf32>
    %26 = vector.broadcast %24 : vector<8x1x16xf32> to vector<8x16x16xf32>
    %27 = arith.subf %25, %26 : vector<8x16x16xf32>
    %28 = arith.mulf %27, %27 : vector<8x16x16xf32>
    %29 = arith.addf %22, %28 : vector<8x16x16xf32>
    %cst = arith.constant 9.99999996E-13 : f32
    %30 = vector.broadcast %cst : f32 to vector<8x16x16xf32>
    %31 = arith.addf %29, %30 : vector<8x16x16xf32>
    %32 = math.sqrt %31 : vector<8x16x16xf32>
    %cst_15 = arith.constant 2.23606801 : f32
    %33 = vector.broadcast %cst_15 : f32 to vector<8x16x16xf32>
    %34 = arith.mulf %33, %32 : vector<8x16x16xf32>
    %cst_16 = arith.constant 1.000000e+00 : f32
    %35 = vector.broadcast %cst_16 : f32 to vector<8x16x16xf32>
    %36 = arith.addf %35, %34 : vector<8x16x16xf32>
    %cst_17 = arith.constant 1.66666663 : f32
    %37 = vector.broadcast %cst_17 : f32 to vector<8x16x16xf32>
    %38 = arith.mulf %37, %29 : vector<8x16x16xf32>
    %39 = arith.addf %36, %38 : vector<8x16x16xf32>
    %cst_18 = arith.constant 0.000000e+00 : f32
    %40 = vector.broadcast %cst_18 : f32 to vector<8x16x16xf32>
    %41 = arith.subf %40, %34 : vector<8x16x16xf32>
    %42 = math.exp %41 : vector<8x16x16xf32>
    %43 = arith.mulf %39, %42 : vector<8x16x16xf32>
    %44 = vector.shape_cast %43 : vector<8x16x16xf32> to vector<2x4x16x16xf32>
    %c0_19 = arith.constant 0 : index
    %c0_20 = arith.constant 0 : index
    %c0_21 = arith.constant 0 : index
    %c0_22 = arith.constant 0 : index
    %45 = vector.load %arg8[%c0_19, %c0_20, %c0_21, %c0_22] : memref<2x4x16x16xf32, #tpu.memory_space<vmem>>, vector<2x4x16x16xf32>
    tpu.vector_store %arg8[%c0_19, %c0_20, %c0_21, %c0_22], %44 {strides = array<i32>} : memref<2x4x16x16xf32, #tpu.memory_space<vmem>>, vector<2x4x16x16xf32>,
    return
  }
  func.func @transform_0(%arg0: i32, %arg1: i32, %arg2: i32, %arg3: i32) -> (i32, i32, i32, i32) {
    %c0_i32 = arith.constant 0 : i32
    %c0_i32_0 = arith.constant 0 : i32
    return %arg1, %arg0, %arg2, %c0_i32 : i32, i32, i32, i32
  }
  func.func @transform_1(%arg0: i32, %arg1: i32, %arg2: i32, %arg3: i32) -> (i32, i32, i32, i32) {
    %c0_i32 = arith.constant 0 : i32
    %c0_i32_0 = arith.constant 0 : i32
    return %arg1, %arg0, %c0_i32, %arg3 : i32, i32, i32, i32
  }
  func.func @transform_2(%arg0: i32, %arg1: i32, %arg2: i32, %arg3: i32) -> (i32, i32, i32, i32) {
    %c0_i32 = arith.constant 0 : i32
    %c0_i32_0 = arith.constant 0 : i32
    %c0_i32_1 = arith.constant 0 : i32
    %c0_i32_2 = arith.constant 0 : i32
    return %c0_i32, %arg0, %c0_i32_0, %c0_i32_1 : i32, i32, i32, i32
  }
  func.func @transform_3(%arg0: i32, %arg1: i32, %arg2: i32, %arg3: i32) -> (i32, i32, i32, i32) {
    %c0_i32 = arith.constant 0 : i32
    %c0_i32_0 = arith.constant 0 : i32
    %c0_i32_1 = arith.constant 0 : i32
    %c0_i32_2 = arith.constant 0 : i32
    return %c0_i32, %arg0, %c0_i32_0, %c0_i32_1 : i32, i32, i32, i32
  }
  func.func @transform_4(%arg0: i32, %arg1: i32, %arg2: i32, %arg3: i32) -> (i32, i32, i32, i32) {
    %c0_i32 = arith.constant 0 : i32
    return %arg1, %arg0, %arg2, %arg3 : i32, i32, i32, i32
  }
}

</mosaic_0001>

<bundles_post_ra>
// kernel: tpu_custom_call.1
= control target key start
LH: loop header
LB: loop body
LE: loop exit
PB: predicated region body
PF: predicated region fallthrough
CT: control target
= control target key end

     0   :  { %v943_v2 = vmov 0   ;;  %s1511_s0 = inlined_call_operand.vmem [shape: f32[2,4,16,3], index: 0, kind: input, shape index: {}]   ;;  %s1512_s1 = inlined_call_operand.vmem [shape: f32[2,4,3,16], index: 1, kind: input, shape index: {}]   ;;  %s1513_s2 = inlined_call_operand.vmem [shape: f32[1,4,1,3], index: 2, kind: input, shape index: {}]   ;;  %s1514_s3 = inlined_call_operand.vmem [shape: f32[1,4,3,1], index: 3, kind: input, shape index: {}]   ;;  %s1515_s4 = inlined_call_operand.hbm [shape: f32[2,4,16,16], index: 4, kind: output, shape index: {}]  }
   0x1   :  { %v88_v0 = vld [vmem:[%s1514_s3 + $0x8] sm:$0x7]  ;;  %v86_v1 = vld [vmem:[%s1514_s3] sm:$0x7]  ;;  %850 = vset.pattern.permute.xlu1 %v943_v2  ;;  %849 = vset.pattern.permute.xlu0 %v943_v2  ;;  %v89_v3 = vld [vmem:[%s1514_s3 + $0xc] sm:$0x7] }
   0x2   :  { %102 = vperm.xlu1 %850, %v88_v0   ;;  %92 = vperm.xlu0 %849, %v86_v1   ;;  %v19_v4 = vld [vmem:[%s1511_s0 + $0x8] sm:$0xff]  ;;  %v87_v5 = vld [vmem:[%s1514_s3 + $0x4] sm:$0x7]  ;;  %v839_v6 = vld [vmem:[%s1513_s2] ss:$0 sm:$0xff] }
   0x3   :  { %v18_v7 = vld [vmem:[%s1511_s0] sm:$0xff]  ;;  %v995_v8 = vmul.f32 %v839_v6, %v19_v4  ;;  %v21_v10 = vld [vmem:[%s1511_s0 + $0x18] sm:$0xff]  ;;  %v20_v12 = vld [vmem:[%s1511_s0 + $0x10] sm:$0xff] }
   0x4   :  { %v997_v9 = vmul.f32 %v839_v6, %v18_v7  ;;  %v840_v11 = vld [vmem:[%s1513_s2 + $0x1] ss:$0 sm:$0xff] }
   0x5   :  { %v1010_v13 = vmul.f32 %v840_v11, %v21_v10  ;;  %v1012_v14 = vmul.f32 %v840_v11, %v20_v12 }
   0x6   :  { %107 = vperm.xlu1 %850, %v89_v3   ;;  %97 = vperm.xlu0 %849, %v87_v5  }
   0xa   :  { %125 = vperm.xlu1 %850, %v995_v8   ;;  %120 = vperm.xlu0 %849, %v997_v9  }
   0xb   :  { %9 = vsyncpa [#allocation3], 0  ;;  %v23_v15 = vld [vmem:[%s1511_s0 + $0x28] sm:$0xff]  ;;  %v841_v16 = vld [vmem:[%s1513_s2 + $0x2] ss:$0 sm:$0xff]  ;;  %v944_v41 = vmov 1   ;;  %v198_v43 = vlaneseq }
   0xc   :  { %v22_v17 = vld [vmem:[%s1511_s0 + $0x20] sm:$0xff]  ;;  %v67_v18 = vmul.f32 %v841_v16, %v23_v15  ;;  %v25_v20 = vld [vmem:[%s1511_s0 + $0x38] sm:$0xff]  ;;  %v24_v22 = vld [vmem:[%s1511_s0 + $0x30] sm:$0xff]  ;;  %v945_v42 = vmov 2   ;;  %vm806_vm11 = vcmask 130048  }
   0xd   :  { %v66_v19 = vmul.f32 %v841_v16, %v22_v17  ;;  %v842_v21 = vld [vmem:[%s1513_s2 + $0x3] ss:$0 sm:$0xff]  ;;  %v27_v25 = vld [vmem:[%s1511_s0 + $0x48] sm:$0xff]  ;;  %v29_v29 = vld [vmem:[%s1511_s0 + $0x58] sm:$0xff]  ;;  %v1071_v47 = vshrl.u32 %v198_v43, 7 }
   0xe   :  { %135 = vperm.xlu1 %850, %v1010_v13   ;;  %130 = vperm.xlu0 %849, %v1012_v14   ;;  %v69_v23 = vmul.f32 %v842_v21, %v25_v20  ;;  %v68_v24 = vmul.f32 %v842_v21, %v24_v22  ;;  %v26_v26 = vld [vmem:[%s1511_s0 + $0x40] sm:$0xff]  ;;  %v71_v27 = vmul.f32 %v839_v6, %v27_v25  ;;  %v28_v30 = vld [vmem:[%s1511_s0 + $0x50] sm:$0xff]  ;;  %v31_v33 = vld [vmem:[%s1511_s0 + $0x68] sm:$0xff] }
   0xf   :  { %v70_v28 = vmul.f32 %v839_v6, %v26_v26  ;;  %v73_v31 = vmul.f32 %v840_v11, %v29_v29  ;;  %v72_v32 = vmul.f32 %v840_v11, %v28_v30  ;;  %v30_v34 = vld [vmem:[%s1511_s0 + $0x60] sm:$0xff]  ;;  %v75_v35 = vmul.f32 %v841_v16, %v31_v33  ;;  %v33_v37 = vld [vmem:[%s1511_s0 + $0x78] sm:$0xff]  ;;  %v32_v38 = vld [vmem:[%s1511_s0 + $0x70] sm:$0xff] }
  0x10   :  { %v74_v36 = vmul.f32 %v841_v16, %v30_v34  ;;  %v77_v39 = vmul.f32 %v842_v21, %v33_v37  ;;  %v76_v40 = vmul.f32 %v842_v21, %v32_v38  ;;  %v79_v46 = vld [vmem:[%s1512_s1 + $0x4] sm:$0x7]  ;;  %v1076_v51 = vsub.s32 0, %v1071_v47  ;;  %v80_v52 = vld [vmem:[%s1512_s1 + $0x8] sm:$0x7] }
  0x11   :  { %v81_v57 = vld [vmem:[%s1512_s1 + $0xc] sm:$0x7]  ;;  %v82_v63 = vld [vmem:[%s1512_s1 + $0x10] sm:$0x7]  ;;  %v83_v5 = vld [vmem:[%s1512_s1 + $0x14] sm:$0x7] }
  0x12   :  { %145 = vperm.xlu1 %850, %v67_v18   ;;  %140 = vperm.xlu0 %849, %v66_v19   ;;  %v84_v11 = vld [vmem:[%s1512_s1 + $0x18] sm:$0x7] }
  0x16   :  { %155 = vperm.xlu1 %850, %v69_v23   ;;  %150 = vperm.xlu0 %849, %v68_v24  }
  0x1a   :  { %165 = vperm.xlu1 %850, %v71_v27   ;;  %160 = vperm.xlu0 %849, %v70_v28  }
  0x1e   :  { %175 = vperm.xlu1 %850, %v73_v31   ;;  %170 = vperm.xlu0 %849, %v72_v32  }
  0x22   :  { %185 = vperm.xlu1 %850, %v75_v35   ;;  %180 = vperm.xlu0 %849, %v74_v36  }
  0x26   :  { %195 = vperm.xlu1 %850, %v77_v39   ;;  %190 = vperm.xlu0 %849, %v76_v40  }
  0x2a   :  { %852 = vset.pattern.permute.xlu1 %v944_v41  ;;  %851 = vset.pattern.permute.xlu0 %v944_v41 }
  0x2b   :  { %267 = vperm.xlu1 %852, %v995_v8   ;;  %263 = vperm.xlu0 %851, %v997_v9  }
  0x2f   :  { %271 = vperm.xlu1 %852, %v1012_v14   ;;  %275 = vperm.xlu0 %851, %v1010_v13  }
  0x33   :  { %279 = vperm.xlu1 %852, %v66_v19   ;;  %283 = vperm.xlu0 %851, %v67_v18  }
  0x37   :  { %287 = vperm.xlu1 %852, %v68_v24   ;;  %291 = vperm.xlu0 %851, %v69_v23  }
  0x3b   :  { %295 = vperm.xlu1 %852, %v70_v28   ;;  %299 = vperm.xlu0 %851, %v71_v27  }
  0x3f   :  { %303 = vperm.xlu1 %852, %v72_v32   ;;  %307 = vperm.xlu0 %851, %v73_v31  }
  0x43   :  { %311 = vperm.xlu1 %852, %v74_v36   ;;  %315 = vperm.xlu0 %851, %v75_v35  }
  0x47   :  { %319 = vperm.xlu1 %852, %v76_v40   ;;  %323 = vperm.xlu0 %851, %v77_v39  }
  0x4b   :  { %853 = vset.pattern.permute.xlu1 %v945_v42  ;;  %854 = vset.pattern.permute.xlu0 %v945_v42 }
  0x4c   :  { %407 = vperm.xlu1 %853, %v997_v9   ;;  %411 = vperm.xlu0 %854, %v995_v8  }
  0x50   :  { %415 = vperm.xlu1 %853, %v1012_v14   ;;  %423 = vperm.xlu0 %854, %v66_v19  }
  0x54   :  { %419 = vperm.xlu1 %853, %v1010_v13   ;;  %431 = vperm.xlu0 %854, %v68_v24  }
  0x58   :  { %427 = vperm.xlu1 %853, %v67_v18   ;;  %439 = vperm.xlu0 %854, %v70_v28   ;;  %v85_v18 = vld [vmem:[%s1512_s1 + $0x1c] sm:$0x7] }
  0x5c   :  { %435 = vperm.xlu1 %853, %v69_v23   ;;  %447 = vperm.xlu0 %854, %v72_v32  }
  0x60   :  { %443 = vperm.xlu1 %853, %v71_v27   ;;  %455 = vperm.xlu0 %854, %v74_v36   ;;  %v328_v36 = vsub.s32 1, %v1071_v47 }
  0x64   :  { %451 = vperm.xlu1 %853, %v73_v31   ;;  %463 = vperm.xlu0 %854, %v76_v40  }
  0x68   :  { %459 = vperm.xlu1 %853, %v75_v35  }
  0x6c   :  { %467 = vperm.xlu1 %853, %v77_v39  }
  0x81   :  { %v103_v44 = vpop.permute.xlu1 %102  ;;  %v1066_v45 = vpop.permute.xlu0 %92 }
  0x82   :  { %v1089_v56 = vmul.f32 %v103_v44, %v80_v52  ;;  %v1110_v3 = vmul.f32 %v1066_v45, %v82_v63  ;;  %v1129_v16 = vmul.f32 %v103_v44, %v84_v11 }
  0x84   :  { %v1101_v62 = vrot.slane %v1089_v56, %v1076_v51  ;;  %v217_v10 = vrot.slane %v1110_v3, %v1076_v51  ;;  %v225_v24 = vrot.slane %v1129_v16, %v1076_v51  ;;  %v1158_v43 = vrot.slane %v1089_v56, %v328_v36 }
  0x85   :  { %v108_v48 = vpop.permute.xlu1 %107  ;;  %v98_v49 = vpop.permute.xlu0 %97  ;;  %v345_v11 = vrot.slane %v1110_v3, %v328_v36 }
  0x86   :  { %v1073_v50 = vmul.f32 %v98_v49, %v79_v46  ;;  %v1097_v61 = vmul.f32 %v108_v48, %v81_v57  ;;  %v1122_v9 = vmul.f32 %v98_v49, %v83_v5  ;;  %v1136_v23 = vmul.f32 %v108_v48, %v85_v18 }
  0x88   :  { %v1087_v55 = vrot.slane %v1073_v50, %v1076_v51  ;;  %v1114_v4 = vrot.slane %v1097_v61, %v1076_v51  ;;  %v221_v17 = vrot.slane %v1122_v9, %v1076_v51  ;;  %v229_v29 = vrot.slane %v1136_v23, %v1076_v51 }
  0x89   :  { %v1081_v53 = vpop.permute.xlu1 %125  ;;  %v1083_v54 = vpop.permute.xlu0 %120  ;;  %v1152_v37 = vrot.slane %v1073_v50, %v328_v36 }
  0x8d   :  { %v136_v58 = vpop.permute.xlu1 %135  ;;  %v1094_v59 = vpop.permute.xlu0 %130 }
  0x8e   :  { %v233_v60 = vsub.f32 %v136_v58, %v1087_v55  ;;  %v1166_v58 = vrot.slane %v1097_v61, %v328_v36 }
  0x90   :  { %v249_v41 = vmul.f32 %v233_v60, %v233_v60 }
  0x91   :  { %v146_v0 = vpop.permute.xlu1 %145  ;;  %v1106_v1 = vpop.permute.xlu0 %140 }
  0x92   :  { %v235_v2 = vsub.f32 %v146_v0, %v1101_v62 }
  0x94   :  { %v251_v52 = vmul.f32 %v235_v2, %v235_v2 }
  0x95   :  { %v156_v6 = vpop.permute.xlu1 %155  ;;  %v1119_v7 = vpop.permute.xlu0 %150 }
  0x96   :  { %v237_v8 = vsub.f32 %v156_v6, %v1114_v4 }
  0x98   :  { %v253_v6 = vmul.f32 %v237_v8, %v237_v8 }
  0x99   :  { %v166_v12 = vpop.permute.xlu1 %165  ;;  %v161_v13 = vpop.permute.xlu0 %160 }
  0x9a   :  { %v239_v14 = vsub.f32 %v166_v12, %v217_v10  ;;  %v238_v15 = vsub.f32 %v161_v13, %v217_v10 }
  0x9d   :  { %v176_v19 = vpop.permute.xlu1 %175  ;;  %v171_v20 = vpop.permute.xlu0 %170 }
  0x9e   :  { %v241_v21 = vsub.f32 %v176_v19, %v221_v17  ;;  %v240_v22 = vsub.f32 %v171_v20, %v221_v17  ;;  %v349_v19 = vrot.slane %v1122_v9, %v328_v36  ;;  %v78_v20 = vld [vmem:[%s1512_s1] sm:$0x7]  ;;  %s946_s1 = smov [#allocation2]  }
  0x9f   :  { %s828_s23 = sshll.u32 %s946_s1, 4  ;;  %s829_s23 = int_to_ptr.vmem [resolvable:$true] %s828_s23 }
  0xa0   :  { %s919_s2 = scalar_lea.vmem %s829_s23, 2048  ;;  %p924_p1 = scmp.lt.s32.totalorder %s829_s23, %s829_s23 }
  0xa1   :  { %v186_v25 = vpop.permute.xlu1 %185  ;;  %v181_v26 = vpop.permute.xlu0 %180  ;;  %p920_p0 = scmp.ne.s32.totalorder %s829_s23, %s919_s2  ;;  %p925_p2 = scmp.lt.s32.totalorder %s919_s2, %s919_s2 }
  0xa2   :  { %v1140_v27 = vsub.f32 %v186_v25, %v225_v24  ;;  %v1142_v28 = vsub.f32 %v181_v26, %v225_v24  ;;  %v255_v24 = vmul.f32 %v239_v14, %v239_v14  ;;  %v254_v25 = vmul.f32 %v238_v15, %v238_v15 }
  0xa3   :  { %p926_p3 = por %p925_p2, %p924_p1 }
  0xa5   :  { %v196_v30 = vpop.permute.xlu1 %195  ;;  %v191_v31 = vpop.permute.xlu0 %190  ;;  %p927_p4 = pnand %p926_p3, %p920_p0 }
  0xa6   :  { %v1146_v32 = vsub.f32 %v196_v30, %v229_v29  ;;  %v1148_v33 = vsub.f32 %v191_v31, %v229_v29 }
  0xaa   :  { %v268_v34 = vpop.permute.xlu1 %267  ;;  %v264_v35 = vpop.permute.xlu0 %263 }
  0xae   :  { %v1154_v38 = vpop.permute.xlu1 %271  ;;  %v276_v39 = vpop.permute.xlu0 %275 }
  0xaf   :  { %v361_v40 = vsub.f32 %v276_v39, %v1152_v37 }
  0xb1   :  { %v377_v42 = vmul.f32 %v361_v40, %v361_v40 }
  0xb2   :  { %v1160_v44 = vpop.permute.xlu1 %279  ;;  %v284_v46 = vpop.permute.xlu0 %283 }
  0xb3   :  { %v1162_v48 = vadd.f32 %v377_v42, %v249_v41  ;;  %v363_v49 = vsub.f32 %v284_v46, %v1158_v43  ;;  %v110_v42 = vmul.f32 %v1066_v45, %v78_v20  ;;  %v353_v46 = vrot.slane %v1129_v16, %v328_v36 }
  0xb4   :  { %v259_v45 = vmul.f32 %v1140_v27, %v1140_v27  ;;  %v1203_v27 = vsub.s32 2, %v1071_v47 }
  0xb5   :  { %v379_v57 = vmul.f32 %v363_v49, %v363_v49  ;;  %v257_v49 = vmul.f32 %v241_v21, %v241_v21  ;;  %v258_v21 = vmul.f32 %v1142_v28, %v1142_v28  ;;  %v261_v28 = vmul.f32 %v1146_v32, %v1146_v32 }
  0xb6   :  { %v1168_v63 = vpop.permute.xlu1 %287  ;;  %v292_v0 = vpop.permute.xlu0 %291 }
  0xb7   :  { %v1170_v60 = vadd.f32 %v379_v57, %v251_v52  ;;  %v365_v5 = vsub.f32 %v292_v0, %v1166_v58  ;;  %v256_v52 = vmul.f32 %v240_v22, %v240_v22 }
  0xb9   :  { %v381_v10 = vmul.f32 %v365_v5, %v365_v5 }
  0xba   :  { %v296_v12 = vpop.permute.xlu1 %295  ;;  %v300_v13 = vpop.permute.xlu0 %299 }
  0xbb   :  { %v1174_v17 = vadd.f32 %v381_v10, %v253_v6  ;;  %v366_v2 = vsub.f32 %v296_v12, %v345_v11  ;;  %v367_v18 = vsub.f32 %v300_v13, %v345_v11  ;;  %v201_v12 = vrot.slane %v110_v42, %v1076_v51 }
  0xbc   :  { %v329_v13 = vrot.slane %v110_v42, %v328_v36 }
  0xbd   :  { %v382_v26 = vmul.f32 %v366_v2, %v366_v2  ;;  %v383_v29 = vmul.f32 %v367_v18, %v367_v18  ;;  %v357_v2 = vrot.slane %v1136_v23, %v328_v36  ;;  %v231_v36 = vsub.f32 %v1081_v53, %v201_v12 }
  0xbe   :  { %v304_v8 = vpop.permute.xlu1 %303  ;;  %v308_v30 = vpop.permute.xlu0 %307  ;;  %v358_v20 = vsub.f32 %v264_v35, %v329_v13  ;;  %v360_v53 = vsub.f32 %v1154_v38, %v1152_v37  ;;  %v477_v37 = vrot.slane %v1073_v50, %v1203_v27  ;;  %v481_v38 = vrot.slane %v1089_v56, %v1203_v27 }
  0xbf   :  { %v1180_v31 = vadd.f32 %v382_v26, %v254_v25  ;;  %v1182_v39 = vadd.f32 %v383_v29, %v255_v24  ;;  %v368_v40 = vsub.f32 %v304_v8, %v349_v19  ;;  %v369_v41 = vsub.f32 %v308_v30, %v349_v19 }
  0xc0   :  { %v359_v19 = vsub.f32 %v268_v34, %v329_v13  ;;  %v230_v30 = vsub.f32 %v1083_v54, %v201_v12  ;;  %v260_v34 = vmul.f32 %v1148_v33, %v1148_v33  ;;  %v362_v54 = vsub.f32 %v1160_v44, %v1158_v43 }
  0xc1   :  { %v384_v57 = vmul.f32 %v368_v40, %v368_v40  ;;  %v385_v0 = vmul.f32 %v369_v41, %v369_v41  ;;  %v376_v13 = vmul.f32 %v360_v53, %v360_v53 }
  0xc2   :  { %v312_v14 = vpop.permute.xlu1 %311  ;;  %v316_v15 = vpop.permute.xlu0 %315  ;;  %v375_v41 = vmul.f32 %v359_v19, %v359_v19  ;;  %v246_v33 = vmul.f32 %v230_v30, %v230_v30 }
  0xc3   :  { %v1186_v5 = vadd.f32 %v384_v57, %v256_v52  ;;  %v1188_v6 = vadd.f32 %v385_v0, %v257_v49  ;;  %v370_v10 = vsub.f32 %v312_v14, %v353_v46  ;;  %v371_v11 = vsub.f32 %v316_v15, %v353_v46 }
  0xc4   :  { %v374_v46 = vmul.f32 %v358_v20, %v358_v20  ;;  %v473_v49 = vrot.slane %v110_v42, %v1203_v27  ;;  %v247_v0 = vmul.f32 %v231_v36, %v231_v36  ;;  %v234_v42 = vsub.f32 %v1106_v1, %v1101_v62 }
  0xc5   :  { %v386_v22 = vmul.f32 %v370_v10, %v370_v10  ;;  %v387_v18 = vmul.f32 %v371_v11, %v371_v11  ;;  %v232_v10 = vsub.f32 %v1094_v59, %v1087_v55  ;;  %v364_v62 = vsub.f32 %v1168_v63, %v1166_v58 }
  0xc6   :  { %v320_v24 = vpop.permute.xlu1 %319  ;;  %v324_v25 = vpop.permute.xlu0 %323  ;;  %v391_v43 = vadd.f32 %v375_v41, %v247_v0  ;;  %v390_v44 = vadd.f32 %v374_v46, %v246_v33  ;;  %v250_v50 = vmul.f32 %v234_v42, %v234_v42  ;;  %v236_v36 = vsub.f32 %v1119_v7, %v1114_v4 }
  0xc7   :  { %v1196_v26 = vadd.f32 %v386_v22, %v258_v21  ;;  %v1198_v29 = vadd.f32 %v387_v18, %v259_v45  ;;  %v372_v51 = vsub.f32 %v320_v24, %v357_v2  ;;  %v373_v8 = vsub.f32 %v324_v25, %v357_v2 }
  0xc8   :  { %v378_v2 = vmul.f32 %v362_v54, %v362_v54  ;;  %v248_v19 = vmul.f32 %v232_v10, %v232_v10  ;;  %v380_v58 = vmul.f32 %v364_v62, %v364_v62  ;;  %v1240_v46 = vrot.slane %v1110_v3, %v1203_v27 }
  0xc9   :  { %v388_v35 = vmul.f32 %v372_v51, %v372_v51  ;;  %v389_v40 = vmul.f32 %v373_v8, %v373_v8  ;;  %v485_v51 = vrot.slane %v1097_v61, %v1203_v27  ;;  %v1250_v33 = vrot.slane %v1129_v16, %v1203_v27 }
  0xca   :  { %v392_v30 = vadd.f32 %v376_v13, %v248_v19  ;;  %v1261_v10 = vrot.slane %v1136_v23, %v1203_v27 }
  0xcb   :  { %v1214_v47 = vadd.f32 %v388_v35, %v260_v34  ;;  %v1216_v52 = vadd.f32 %v389_v40, %v261_v28  ;;  %v408_v32 = vpop.permute.xlu1 %407  ;;  %v412_v57 = vpop.permute.xlu0 %411  ;;  %v394_v28 = vadd.f32 %v378_v2, %v250_v50 }
  0xcc   :  { %v502_v14 = vsub.f32 %v408_v32, %v473_v49  ;;  %v503_v15 = vsub.f32 %v412_v57, %v473_v49  ;;  %v252_v49 = vmul.f32 %v236_v36, %v236_v36 }
  0xce   :  { %v518_v11 = vmul.f32 %v502_v14, %v502_v14  ;;  %v519_v12 = vmul.f32 %v503_v15, %v503_v15  ;;  %v396_v0 = vadd.f32 %v380_v58, %v252_v49  ;;  %v1257_v15 = vrot.slane %v1122_v9, %v1203_v27 }
  0xcf   :  { %v416_v45 = vpop.permute.xlu1 %415  ;;  %v424_v21 = vpop.permute.xlu0 %423 }
  0xd0   :  { %v534_v22 = vadd.f32 %v518_v11, %v390_v44  ;;  %v535_v18 = vadd.f32 %v519_v12, %v391_v43  ;;  %v504_v55 = vsub.f32 %v416_v45, %v477_v37  ;;  %v506_v59 = vsub.f32 %v424_v21, %v481_v38 }
  0xd2   :  { %v1228_v1 = vadd.f32 1e-12, %v534_v22  ;;  %v1230_v56 = vadd.f32 1e-12, %v535_v18  ;;  %v520_v20 = vmul.f32 %v504_v55, %v504_v55  ;;  %v522_v24 = vmul.f32 %v506_v59, %v506_v59 }
  0xd3   :  { %v420_v25 = vpop.permute.xlu1 %419  ;;  %v432_v8 = vpop.permute.xlu0 %431  ;;  %v1252_v3 = vmul.f32 1.6666666, %v534_v22  ;;  %v1266_v16 = vmul.f32 1.6666666, %v535_v18 }
  0xd4   :  { %855 = vrsqrt.f32 %v1228_v1  ;;  %v536_v63 = vadd.f32 %v520_v20, %v392_v30  ;;  %v538_v34 = vadd.f32 %v522_v24, %v394_v28  ;;  %v505_v35 = vsub.f32 %v420_v25, %v477_v37 }
  0xd5   :  { %857 = vrsqrt.f32 %v1230_v56  ;;  %v508_v40 = vsub.f32 %v432_v8, %v485_v51  ;;  %vm568_vm0 = vcmp.eq.f32.partialorder %v1228_v1, inf  ;;  %vm570_vm1 = vcmp.eq.f32.partialorder %v1228_v1, 0.0 }
  0xd6   :  { %v1242_v53 = vadd.f32 1e-12, %v536_v63  ;;  %v1244_v4 = vadd.f32 1e-12, %v538_v34  ;;  %v521_v7 = vmul.f32 %v505_v35, %v505_v35  ;;  %v571_v9 = vand.u32 2147483648, %v1228_v1 }
  0xd7   :  { %v428_v41 = vpop.permute.xlu1 %427  ;;  %v440_v61 = vpop.permute.xlu0 %439  ;;  %v524_v54 = vmul.f32 %v508_v40, %v508_v40  ;;  %vm575_vm2 = vcmp.eq.f32.partialorder %v1230_v56, inf  ;;  %vm577_vm3 = vcmp.eq.f32.partialorder %v1230_v56, 0.0  ;;  %v578_v21 = vand.u32 2147483648, %v1230_v56 }
  0xd8   :  { %v507_v32 = vsub.f32 %v428_v41, %v481_v38  ;;  %v510_v57 = vsub.f32 %v440_v61, %v1240_v46  ;;  %859 = vrsqrt.f32 %v1242_v53  ;;  %v537_v42 = vadd.f32 %v521_v7, %v1162_v48 }
  0xd9   :  { %861 = vrsqrt.f32 %v1244_v4  ;;  %v540_v37 = vadd.f32 %v524_v54, %v396_v0  ;;  %v1288_v18 = vmul.f32 1.6666666, %v536_v63  ;;  %v1290_v55 = vmul.f32 1.6666666, %v538_v34 }
  0xda   :  { %v523_v38 = vmul.f32 %v507_v32, %v507_v32  ;;  %v526_v43 = vmul.f32 %v510_v57, %v510_v57  ;;  %v1269_v12 = vadd.f32 1e-12, %v537_v42  ;;  %vm582_vm4 = vcmp.eq.f32.partialorder %v1242_v53, inf }
  0xdb   :  { %v436_v14 = vpop.permute.xlu1 %435  ;;  %v1271_v13 = vadd.f32 1e-12, %v540_v37  ;;  %vm584_vm5 = vcmp.eq.f32.partialorder %v1242_v53, 0.0  ;;  %v585_v50 = vand.u32 2147483648, %v1242_v53  ;;  %v448_v24 = vpop.permute.xlu0 %447  ;;  %vm596_vm6 = vcmp.eq.f32.partialorder %v1244_v4, inf }
  0xdc   :  { %v509_v44 = vsub.f32 %v436_v14, %v485_v51  ;;  %v1274_v23 = vadd.f32 %v523_v38, %v1170_v60  ;;  %v1280_v2 = vadd.f32 %v526_v43, %v1180_v31  ;;  %863 = vrsqrt.f32 %v1269_v12 }
  0xdd   :  { %865 = vrsqrt.f32 %v1271_v13  ;;  %vm598_vm7 = vcmp.eq.f32.partialorder %v1244_v4, 0.0  ;;  %v599_v30 = vand.u32 2147483648, %v1244_v4  ;;  %v1311_v63 = vmul.f32 1.6666666, %v537_v42 }
  0xde   :  { %v856_v11 = vpop.eup %855  ;;  %v525_v22 = vmul.f32 %v509_v44, %v509_v44  ;;  %v1300_v20 = vadd.f32 1e-12, %v1274_v23  ;;  %v512_v34 = vsub.f32 %v448_v24, %v1257_v15  ;;  %v1317_v40 = vmul.f32 1.6666666, %v540_v37 }
  0xdf   :  { %v858_v48 = vpop.eup %857  ;;  %v567_v27 = vmul.f32 %v856_v11, %v1228_v1  ;;  %v1320_v41 = vadd.f32 1e-12, %v1280_v2  ;;  %vm589_vm8 = vcmp.eq.f32.partialorder %v1269_v12, inf  ;;  %vm591_vm9 = vcmp.eq.f32.partialorder %v1269_v12, 0.0 }
  0xe0   :  { %v574_v45 = vmul.f32 %v858_v48, %v1230_v56  ;;  %867 = vrsqrt.f32 %v1300_v20  ;;  %v592_v14 = vand.u32 2147483648, %v1269_v12  ;;  %vm610_vm10 = vcmp.eq.f32.partialorder %v1271_v13, inf }
  0xe1   :  { %v569_v60 = vsel %vm568_vm0, %v1228_v1, %v567_v27  ;;  %v1305_v1 = vadd.f32 %v525_v22, %v1174_v17  ;;  %vm612_vm12 = vcmp.eq.f32.partialorder %v1271_v13, 0.0  ;;  %v613_v44 = vand.u32 2147483648, %v1271_v13 }
  0xe2   :  { %v572_v31 = vsel %vm570_vm1, %v571_v9, %v569_v60  ;;  %v576_v59 = vsel %vm575_vm2, %v1230_v56, %v574_v45  ;;  %v860_v25 = vpop.eup %859  ;;  %vm603_vm13 = vcmp.eq.f32.partialorder %v1300_v20, inf  ;;  %vm605_vm14 = vcmp.eq.f32.partialorder %v1300_v20, 0.0 }
  0xe3   :  { %v678_v19 = vmul.f32 2.236068, %v572_v31  ;;  %v579_v62 = vsel %vm577_vm3, %v578_v21, %v576_v59  ;;  %v862_v56 = vpop.eup %861  ;;  %v581_v36 = vmul.f32 %v860_v25, %v1242_v53  ;;  %v1342_v27 = vadd.f32 1e-12, %v1305_v1 }
  0xe4   :  { %v679_v51 = vmul.f32 2.236068, %v579_v62  ;;  %v595_v58 = vmul.f32 %v862_v56, %v1244_v4  ;;  %v444_v62 = vpop.permute.xlu1 %443  ;;  %vm624_vm15 = vcmp.eq.f32.partialorder %v1320_v41, inf  ;;  %vm626_vm0 = vcmp.eq.f32.partialorder %v1320_v41, 0.0 }
  0xe5   :  { %v742_v8 = vsub.f32 0.0, %v678_v19  ;;  %v583_v17 = vsel %vm582_vm4, %v1242_v53, %v581_v36  ;;  %v694_v42 = vadd.f32 1.0, %v678_v19  ;;  %vm617_vm1 = vcmp.eq.f32.partialorder %v1342_v27, inf }
  0xe6   :  { %v743_v28 = vsub.f32 0.0, %v679_v51  ;;  %v586_v49 = vsel %vm584_vm5, %v585_v50, %v583_v17  ;;  %v597_v7 = vsel %vm596_vm6, %v1244_v4, %v595_v58  ;;  %v864_v57 = vpop.eup %863  ;;  %v695_v11 = vadd.f32 1.0, %v679_v51 }
  0xe7   :  { %v758_v35 = vmul.f32 1.442695, %v742_v8  ;;  %v680_v54 = vmul.f32 2.236068, %v586_v49  ;;  %v600_v32 = vsel %vm598_vm7, %v599_v30, %v597_v7  ;;  %v866_v53 = vpop.eup %865  ;;  %v588_v38 = vmul.f32 %v864_v57, %v1269_v12 }
  0xe8   :  { %v760_v61 = vmul.f32 1.442695, %v743_v28  ;;  %v682_v0 = vmul.f32 2.236068, %v600_v32  ;;  %v609_v4 = vmul.f32 %v866_v53, %v1271_v13  ;;  %v726_v31 = vadd.f32 %v1252_v3, %v694_v42 }
  0xe9   :  { %869 = vpow2.f32 %v758_v35  ;;  %v744_v37 = vsub.f32 0.0, %v680_v54  ;;  %v590_v48 = vsel %vm589_vm8, %v1269_v12, %v588_v38  ;;  %v727_v12 = vadd.f32 %v1266_v16, %v695_v11  ;;  %v456_v16 = vpop.permute.xlu0 %455 }
  0xea   :  { %871 = vpow2.f32 %v760_v61  ;;  %v746_v43 = vsub.f32 0.0, %v682_v0  ;;  %v593_v21 = vsel %vm591_vm9, %v592_v14, %v590_v48  ;;  %v611_v22 = vsel %vm610_vm10, %v1271_v13, %v609_v4  ;;  %v868_v60 = vpop.eup %867  ;;  %v452_v14 = vpop.permute.xlu1 %451 }
  0xeb   :  { %873 = vrsqrt.f32 %v1320_v41  ;;  %v762_v9 = vmul.f32 1.442695, %v744_v37  ;;  %v681_v59 = vmul.f32 2.236068, %v593_v21  ;;  %v614_v19 = vsel %vm612_vm12, %v613_v44, %v611_v22 }
  0xec   :  { %v766_v45 = vmul.f32 1.442695, %v746_v43  ;;  %v684_v50 = vmul.f32 2.236068, %v614_v19  ;;  %v602_v24 = vmul.f32 %v868_v60, %v1300_v20  ;;  %v606_v13 = vand.u32 2147483648, %v1300_v20 }
  0xed   :  { %875 = vpow2.f32 %v762_v9  ;;  %v745_v25 = vsub.f32 0.0, %v681_v59  ;;  %v696_v8 = vadd.f32 1.0, %v680_v54  ;;  %v528_v28 = vmul.f32 %v512_v34, %v512_v34  ;;  %v464_v9 = vpop.permute.xlu0 %463 }
  0xee   :  { %877 = vpow2.f32 %v766_v45  ;;  %v748_v51 = vsub.f32 0.0, %v684_v50  ;;  %v604_v3 = vsel %vm603_vm13, %v1300_v20, %v602_v24  ;;  %v698_v17 = vadd.f32 1.0, %v682_v0 }
  0xef   :  { %879 = vrsqrt.f32 %v1342_v27  ;;  %v764_v36 = vmul.f32 1.442695, %v745_v25  ;;  %v607_v30 = vsel %vm605_vm14, %v606_v13, %v604_v3  ;;  %v1362_v20 = vadd.f32 %v528_v28, %v1186_v5 }
  0xf0   :  { %v770_v61 = vmul.f32 1.442695, %v748_v51  ;;  %v683_v49 = vmul.f32 2.236068, %v607_v30  ;;  %v511_v57 = vsub.f32 %v444_v62, %v1240_v46  ;;  %v627_v53 = vand.u32 2147483648, %v1320_v41 }
  0xf1   :  { %881 = vpow2.f32 %v764_v36  ;;  %v728_v0 = vadd.f32 %v1288_v18, %v696_v8  ;;  %v1371_v42 = vadd.f32 1e-12, %v1362_v20  ;;  %v514_v37 = vsub.f32 %v456_v16, %v1250_v33 }
  0xf2   :  { %883 = vpow2.f32 %v770_v61  ;;  %v747_v54 = vsub.f32 0.0, %v683_v49  ;;  %v527_v5 = vmul.f32 %v511_v57, %v511_v57  ;;  %v730_v46 = vadd.f32 %v1290_v55, %v698_v17 }
  0xf3   :  { %v870_v56 = vpop.eup %869  ;;  %v513_v4 = vsub.f32 %v452_v14, %v1257_v15  ;;  %v697_v11 = vadd.f32 1.0, %v681_v59  ;;  %885 = vrsqrt.f32 %v1371_v42  ;;  %v700_v55 = vadd.f32 1.0, %v684_v50 }
  0xf4   :  { %v872_v58 = vpop.eup %871  ;;  %v790_v35 = vmul.f32 %v870_v56, %v726_v31  ;;  %v768_v38 = vmul.f32 1.442695, %v747_v54  ;;  %v1384_v31 = vadd.f32 %v527_v5, %v1182_v39  ;;  %v530_v15 = vmul.f32 %v514_v37, %v514_v37  ;;  %v460_v56 = vpop.permute.xlu1 %459 }
  0xf5   :  { %v874_v7 = vpop.eup %873  ;;  %v791_v32 = vmul.f32 %v872_v58, %v727_v12  ;;  %v529_v59 = vmul.f32 %v513_v4, %v513_v4  ;;  %vm619_vm2 = vcmp.eq.f32.partialorder %v1342_v27, 0.0  ;;  %v516_v62 = vsub.f32 %v464_v9, %v1261_v10 }
  0xf6   :  { %807 = vst.msk [vmem:[#allocation2] sm:$0xff] %vm806_vm11, %v790_v35  ;;  %v623_v34 = vmul.f32 %v874_v7, %v1320_v41  ;;  %887 = vpow2.f32 %v768_v38  ;;  %v620_v50 = vand.u32 2147483648, %v1342_v27  ;;  %v1393_v24 = vadd.f32 1e-12, %v1384_v31 }
  0xf7   :  { %808 = vst.msk [vmem:[#allocation2 + $0x8] sm:$0xff] %vm806_vm11, %v791_v32  ;;  %v876_v44 = vpop.eup %875  ;;  %v1396_v39 = vadd.f32 %v530_v15, %v1196_v26  ;;  %v1399_v12 = vadd.f32 %v529_v59, %v1188_v6  ;;  %v729_v25 = vadd.f32 %v1311_v63, %v697_v11  ;;  %v532_v3 = vmul.f32 %v516_v62, %v516_v62 }
  0xf8   :  { %v625_v43 = vsel %vm624_vm15, %v1320_v41, %v623_v34  ;;  %v878_v48 = vpop.eup %877  ;;  %v792_v45 = vmul.f32 %v876_v44, %v728_v0  ;;  %v732_v36 = vadd.f32 %v1317_v40, %v700_v55  ;;  %v699_v30 = vadd.f32 1.0, %v683_v49  ;;  %v468_v57 = vpop.permute.xlu1 %467 }
  0xf9   :  { %v628_v18 = vsel %vm626_vm0, %v627_v53, %v625_v43  ;;  %v880_v22 = vpop.eup %879  ;;  %v794_v60 = vmul.f32 %v878_v48, %v730_v46  ;;  %889 = vrsqrt.f32 %v1393_v24  ;;  %v715_v63 = vmul.f32 1.6666666, %v1274_v23 }
  0xfa   :  { %v686_v21 = vmul.f32 2.236068, %v628_v18  ;;  %809 = vst.msk [vmem:[#allocation2 + $0x10] sm:$0xff] %vm806_vm11, %v792_v45  ;;  %v616_v19 = vmul.f32 %v880_v22, %v1342_v27  ;;  %v1409_v35 = vadd.f32 1e-12, %v1396_v39  ;;  %v1416_v17 = vadd.f32 %v532_v3, %v1214_v47 }
  0xfb   :  { %811 = vst.msk [vmem:[#allocation2 + $0x20] sm:$0xff] %vm806_vm11, %v794_v60  ;;  %v882_v8 = vpop.eup %881  ;;  %v731_v49 = vadd.f32 %v715_v63, %v699_v30  ;;  %vm638_vm3 = vcmp.eq.f32.partialorder %v1371_v42, inf  ;;  %v641_v47 = vand.u32 2147483648, %v1371_v42  ;;  %vm640_vm4 = vcmp.eq.f32.partialorder %v1371_v42, 0.0 }
  0xfc   :  { %v750_v41 = vsub.f32 0.0, %v686_v21  ;;  %v618_v51 = vsel %vm617_vm1, %v1342_v27, %v616_v19  ;;  %v884_v26 = vpop.eup %883  ;;  %v793_v16 = vmul.f32 %v882_v8, %v729_v25  ;;  %v1412_v27 = vadd.f32 1e-12, %v1399_v12 }
  0xfd   :  { %v621_v28 = vsel %vm619_vm2, %v620_v50, %v618_v51  ;;  %v796_v58 = vmul.f32 %v884_v26, %v732_v36  ;;  %v886_v61 = vpop.eup %885  ;;  %v702_v54 = vadd.f32 1.0, %v686_v21  ;;  %v1427_v53 = vadd.f32 1e-12, %v1416_v17 }
  0xfe   :  { %v774_v13 = vmul.f32 1.442695, %v750_v41  ;;  %v685_v6 = vmul.f32 2.236068, %v621_v28  ;;  %810 = vst.msk [vmem:[#allocation2 + $0x18] sm:$0xff] %vm806_vm11, %v793_v16  ;;  %v637_v32 = vmul.f32 %v886_v61, %v1371_v42  ;;  %v515_v37 = vsub.f32 %v460_v56, %v1250_v33 }
  0xff   :  { %813 = vst.msk [vmem:[#allocation2 + $0x30] sm:$0xff] %vm806_vm11, %v796_v58  ;;  %v718_v0 = vmul.f32 1.6666666, %v1280_v2  ;;  %v517_v46 = vsub.f32 %v468_v57, %v1261_v10  ;;  %v717_v44 = vmul.f32 1.6666666, %v1305_v1  ;;  %vm631_vm5 = vcmp.eq.f32.partialorder %v1393_v24, inf }
 0x100   :  { %891 = vpow2.f32 %v774_v13  ;;  %v749_v40 = vsub.f32 0.0, %v685_v6  ;;  %v888_v7 = vpop.eup %887  ;;  %v639_v34 = vsel %vm638_vm3, %v1371_v42, %v637_v32  ;;  %v531_v42 = vmul.f32 %v515_v37, %v515_v37 }
 0x101   :  { %893 = vrsqrt.f32 %v1409_v35  ;;  %v795_v14 = vmul.f32 %v888_v7, %v731_v49  ;;  %v642_v5 = vsel %vm640_vm4, %v641_v47, %v639_v34  ;;  %v734_v4 = vadd.f32 %v718_v0, %v702_v54 }
 0x102   :  { %v772_v23 = vmul.f32 1.442695, %v749_v40  ;;  %895 = vrsqrt.f32 %v1412_v27  ;;  %v688_v38 = vmul.f32 2.236068, %v642_v5  ;;  %v533_v11 = vmul.f32 %v517_v46, %v517_v46 }
 0x103   :  { %812 = vst.msk [vmem:[#allocation2 + $0x28] sm:$0xff] %vm806_vm11, %v795_v14  ;;  %v890_v43 = vpop.eup %889  ;;  %v634_v2 = vand.u32 2147483648, %v1393_v24  ;;  %v701_v45 = vadd.f32 1.0, %v685_v6  ;;  %v1439_v10 = vadd.f32 %v531_v42, %v1198_v29  ;;  %vm633_vm6 = vcmp.eq.f32.partialorder %v1393_v24, 0.0 }
 0x104   :  { %897 = vpow2.f32 %v772_v23  ;;  %v752_v9 = vsub.f32 0.0, %v688_v38  ;;  %v630_v48 = vmul.f32 %v890_v43, %v1393_v24  ;;  %v1442_v55 = vadd.f32 %v533_v11, %v1216_v52 }
 0x105   :  { %899 = vrsqrt.f32 %v1427_v53  ;;  %vm652_vm7 = vcmp.eq.f32.partialorder %v1409_v35, inf  ;;  %vm654_vm8 = vcmp.eq.f32.partialorder %v1409_v35, 0.0  ;;  %v1450_v15 = vadd.f32 1e-12, %v1439_v10 }
 0x106   :  { %v778_v21 = vmul.f32 1.442695, %v752_v9  ;;  %v632_v1 = vsel %vm631_vm5, %v1393_v24, %v630_v48  ;;  %v1453_v29 = vadd.f32 1e-12, %v1442_v55  ;;  %v655_v19 = vand.u32 2147483648, %v1409_v35 }
 0x107   :  { %v635_v60 = vsel %vm633_vm6, %v634_v2, %v632_v1  ;;  %v733_v62 = vadd.f32 %v717_v44, %v701_v45  ;;  %vm645_vm9 = vcmp.eq.f32.partialorder %v1412_v27, inf  ;;  %vm647_vm10 = vcmp.eq.f32.partialorder %v1412_v27, 0.0 }
 0x108   :  { %901 = vpow2.f32 %v778_v21  ;;  %v687_v59 = vmul.f32 2.236068, %v635_v60  ;;  %v648_v51 = vand.u32 2147483648, %v1412_v27  ;;  %v704_v16 = vadd.f32 1.0, %v688_v38 }
 0x109   :  { %903 = vrsqrt.f32 %v1450_v15  ;;  %vm666_vm12 = vcmp.eq.f32.partialorder %v1427_v53, inf  ;;  %vm668_vm13 = vcmp.eq.f32.partialorder %v1427_v53, 0.0  ;;  %v719_v5 = vmul.f32 1.6666666, %v1384_v31 }
 0x10a   :  { %v892_v18 = vpop.eup %891  ;;  %v751_v25 = vsub.f32 0.0, %v687_v59  ;;  %905 = vrsqrt.f32 %v1453_v29  ;;  %v703_v54 = vadd.f32 1.0, %v687_v59  ;;  %vm659_vm14 = vcmp.eq.f32.partialorder %v1450_v15, inf }
 0x10b   :  { %v798_v33 = vmul.f32 %v892_v18, %v734_v4  ;;  %v894_v22 = vpop.eup %893  ;;  %vm661_vm15 = vcmp.eq.f32.partialorder %v1450_v15, 0.0  ;;  %v662_v46 = vand.u32 2147483648, %v1450_v15  ;;  %vm673_vm0 = vcmp.eq.f32.partialorder %v1453_v29, inf }
 0x10c   :  { %v896_v52 = vpop.eup %895  ;;  %v651_v41 = vmul.f32 %v894_v22, %v1409_v35  ;;  %v776_v30 = vmul.f32 1.442695, %v751_v25  ;;  %v735_v38 = vadd.f32 %v719_v5, %v703_v54  ;;  %v676_v42 = vand.u32 2147483648, %v1453_v29 }
 0x10d   :  { %815 = vst.msk [vmem:[#allocation2 + $0x40] sm:$0xff] %vm806_vm11, %v798_v33  ;;  %v644_v50 = vmul.f32 %v896_v52, %v1412_v27  ;;  %vm675_vm1 = vcmp.eq.f32.partialorder %v1453_v29, 0.0  ;;  %v722_v33 = vmul.f32 1.6666666, %v1396_v39  ;;  %v721_v21 = vmul.f32 1.6666666, %v1399_v12 }
 0x10e   :  { %v898_v24 = vpop.eup %897  ;;  %v653_v13 = vsel %vm652_vm7, %v1409_v35, %v651_v41  ;;  %907 = vpow2.f32 %v776_v30  ;;  %v669_v35 = vand.u32 2147483648, %v1427_v53 }
 0x10f   :  { %v797_v3 = vmul.f32 %v898_v24, %v733_v62  ;;  %v656_v56 = vsel %vm654_vm8, %v655_v19, %v653_v13  ;;  %v646_v8 = vsel %vm645_vm9, %v1412_v27, %v644_v50  ;;  %v900_v36 = vpop.eup %899  ;;  %v720_v27 = vmul.f32 1.6666666, %v1362_v20 }
 0x110   :  { %v690_v28 = vmul.f32 2.236068, %v656_v56  ;;  %v649_v26 = vsel %vm647_vm10, %v648_v51, %v646_v8  ;;  %v665_v58 = vmul.f32 %v900_v36, %v1427_v53  ;;  %v725_v36 = vmul.f32 1.6666666, %v1442_v55 }
 0x111   :  { %814 = vst.msk [vmem:[#allocation2 + $0x38] sm:$0xff] %vm806_vm11, %v797_v3  ;;  %v689_v6 = vmul.f32 2.236068, %v649_v26  ;;  %v736_v23 = vadd.f32 %v720_v27, %v704_v16  ;;  %v723_v3 = vmul.f32 1.6666666, %v1439_v10 }
 0x112   :  { %v754_v63 = vsub.f32 0.0, %v690_v28  ;;  %v667_v61 = vsel %vm666_vm12, %v1427_v53, %v665_v58  ;;  %v902_v14 = vpop.eup %901  ;;  %v706_v31 = vadd.f32 1.0, %v690_v28 }
 0x113   :  { %v753_v40 = vsub.f32 0.0, %v689_v6  ;;  %v670_v7 = vsel %vm668_vm13, %v669_v35, %v667_v61  ;;  %v904_v47 = vpop.eup %903  ;;  %v800_v34 = vmul.f32 %v902_v14, %v736_v23  ;;  %v705_v18 = vadd.f32 1.0, %v689_v6 }
 0x114   :  { %v782_v49 = vmul.f32 1.442695, %v754_v63  ;;  %v692_v57 = vmul.f32 2.236068, %v670_v7  ;;  %v658_v20 = vmul.f32 %v904_v47, %v1450_v15  ;;  %v906_v37 = vpop.eup %905  ;;  %v738_v60 = vadd.f32 %v722_v33, %v706_v31 }
 0x115   :  { %v780_v32 = vmul.f32 1.442695, %v753_v40  ;;  %817 = vst.msk [vmem:[#allocation2 + $0x50] sm:$0xff] %vm806_vm11, %v800_v34  ;;  %v672_v4 = vmul.f32 %v906_v37, %v1453_v29  ;;  %v737_v52 = vadd.f32 %v721_v21, %v705_v18 }
 0x116   :  { %909 = vpow2.f32 %v782_v49  ;;  %v756_v0 = vsub.f32 0.0, %v692_v57  ;;  %v660_v43 = vsel %vm659_vm14, %v1450_v15, %v658_v20  ;;  %v708_v59 = vadd.f32 1.0, %v692_v57 }
 0x117   :  { %911 = vpow2.f32 %v780_v32  ;;  %v663_v44 = vsel %vm661_vm15, %v662_v46, %v660_v43  ;;  %v674_v48 = vsel %vm673_vm0, %v1453_v29, %v672_v4  ;;  %v724_v29 = vmul.f32 1.6666666, %v1416_v17 }
 0x118   :  { %v786_v53 = vmul.f32 1.442695, %v756_v0  ;;  %v908_v11 = vpop.eup %907  ;;  %v691_v9 = vmul.f32 2.236068, %v663_v44  ;;  %v677_v45 = vsel %vm675_vm1, %v676_v42, %v674_v48 }
 0x119   :  { %v799_v2 = vmul.f32 %v908_v11, %v735_v38  ;;  %v693_v22 = vmul.f32 2.236068, %v677_v45  ;;  %v740_v12 = vadd.f32 %v724_v29, %v708_v59 }
 0x11a   :  { %913 = vpow2.f32 %v786_v53  ;;  %v755_v1 = vsub.f32 0.0, %v691_v9  ;;  %v707_v51 = vadd.f32 1.0, %v691_v9 }
 0x11b   :  { %816 = vst.msk [vmem:[#allocation2 + $0x48] sm:$0xff] %vm806_vm11, %v799_v2  ;;  %v757_v19 = vsub.f32 0.0, %v693_v22  ;;  %v709_v56 = vadd.f32 1.0, %v693_v22 }
 0x11c   :  { %v784_v41 = vmul.f32 1.442695, %v755_v1  ;;  %v739_v8 = vadd.f32 %v723_v3, %v707_v51 }
 0x11d   :  { %v788_v39 = vmul.f32 1.442695, %v757_v19  ;;  %v741_v28 = vadd.f32 %v725_v36, %v709_v56 }
 0x11e   :  { %915 = vpow2.f32 %v784_v41 }
 0x11f   :  { %917 = vpow2.f32 %v788_v39 }
 0x120   :  { %v910_v15 = vpop.eup %909 }
 0x121   :  { %v912_v62 = vpop.eup %911  ;;  %v802_v50 = vmul.f32 %v910_v15, %v738_v60 }
 0x122   :  { %v801_v24 = vmul.f32 %v912_v62, %v737_v52 }
 0x123   :  { %819 = vst.msk [vmem:[#allocation2 + $0x60] sm:$0xff] %vm806_vm11, %v802_v50 }
 0x124   :  { %818 = vst.msk [vmem:[#allocation2 + $0x58] sm:$0xff] %vm806_vm11, %v801_v24  ;;  %v914_v25 = vpop.eup %913 }
 0x125   :  { %v804_v13 = vmul.f32 %v914_v25, %v740_v12 }
 0x127   :  { %821 = vst.msk [vmem:[#allocation2 + $0x70] sm:$0xff] %vm806_vm11, %v804_v13 }
 0x128   :  { %v916_v17 = vpop.eup %915 }
 0x129   :  { %v803_v30 = vmul.f32 %v916_v17, %v739_v8  ;;  %v918_v26 = vpop.eup %917 }
 0x12a   :  { %v805_v16 = vmul.f32 %v918_v26, %v741_v28 }
 0x12b   :  { %820 = vst.msk [vmem:[#allocation2 + $0x68] sm:$0xff] %vm806_vm11, %v803_v30 }
 0x12c   :  { %822 = vst.msk [vmem:[#allocation2 + $0x78] sm:$0xff] %vm806_vm11, %v805_v16 }
 0x12d   :  { %930 = shalt.err (!%p927_p4)
}
 0x12e   :  { %s931_s26 = scalar_lea.hbm %s1515_s4, 2048 }
 0x12f   :  { %p932_p5 = scmp.ne.s32.totalorder %s1515_s4, %s931_s26  ;;  %p935_p6 = scmp.lt.u32.totalorder %s931_s26, %s1515_s4 }
 0x131   :  { %p937_p7 = pnand %p935_p6, %p932_p5 }
 0x133   :  { %940 = shalt.err (!%p937_p7)
}
 0x134   :  { %s947_s5 = smov 128   ;;  %s948_s3 = smov 8  }
 0x135   :  { %834 = dma.vmem_to_hbm [thread:$0]  %s829_s23, 2048, %s1515_s4, [#allocation3], %s947_s5, %s947_s5, %s948_s3  }
 0x136   :  { %941 = dma.done.wait [#allocation3], 2048  }
 0x137   :  { %942 = vsyncadd [#allocation3], 4294965248 }
 0x138   :  { %838 = vsyncpa [#allocation3], 1 }

</bundles_post_ra>
